<compile_context>
chip_gen: v7x
topology: tpu7x:2x2x1
jax: 0.10.0
libtpu: 0.0.40
codegen_flags: <defaults>
</compile_context>

<pallas_src>
import math

import jax
import jax.numpy as jnp
from jax.experimental import pallas as pl
from jax.experimental.pallas import tpu as pltpu


def build_pos_enc(max_len: int, model_dim: int) -> jnp.ndarray:
    """Precompute the sinusoidal table exactly as the torch module's __init__ does."""
    assert model_dim % 2 == 0, "model_dim must be even (same constraint as the torch module)"
    position = jnp.arange(max_len, dtype=jnp.float32)[:, None]                    # [L, 1]
    exponent = jnp.arange(0, model_dim, 2, dtype=jnp.float32) * (
        -(math.log(10000.0) / model_dim))                                         # [D/2]
    div_term = jnp.exp(exponent)                                                  # [D/2]
    ang = position * div_term                                                     # [L, D/2]
    # interleave: even columns = sin, odd columns = cos
    pe = jnp.stack([jnp.sin(ang), jnp.cos(ang)], axis=-1).reshape(max_len, model_dim)
    return pe.astype(jnp.float32)


def pos_enc_kernel(x_ref, pe_ref, o_ref):
    # x_ref: [tb, tn] tile of the flattened input; pe_ref: [1, tn] resident pe slab.
    # Native-dtype add (pe was cast to x.dtype in the wrapper).
    o_ref[...] = x_ref[...] + pe_ref[...]


def _round_up(n: int, m: int) -> int:
    return ((n + m - 1) // m) * m


def positional_encoding_forward(
    x: jnp.ndarray,
    pos_enc: jnp.ndarray,
    *,
    small_fallback_bytes: int = 256 * 1024,
    vmem_budget_per_buffer: int = 4 * 1024 * 1024,
) -> jnp.ndarray:
    """out = x + pos_enc[:x.shape[2]], x is [B, C, T, D]."""
    B, C, T, D = x.shape
    assert pos_enc.shape[1] == D and pos_enc.shape[0] >= T

    pe_t = pos_enc[:T].astype(x.dtype)                                            # [T, D]

    dtype_bytes = jnp.dtype(x.dtype).itemsize
    total_bytes = B * C * T * D * dtype_bytes
    if total_bytes <= small_fallback_bytes:
        # Tiny input: the fused XLA add beats the pallas_call fixed overhead outright.
        return x + pe_t

    M = B * C
    TD = T * D

    # Lane-dense layout: fold (T, D) into the last axis. If T*D is not a multiple of 128,
    # group g batch rows per flattened row so the last dim becomes a multiple of 128
    # (full-width vst instead of masked vst.msk); fall back to g=1 if M isn't divisible.
    g = 1
    if TD % 128 != 0:
        cand = 128 // math.gcd(TD, 128)
        if M % cand == 0:
            g = cand
    Mg = M // g
    W = g * TD

    x_flat = x.reshape(Mg, W)
    pe_flat = jnp.tile(pe_t.reshape(1, TD), (1, g))                               # [1, W]

    # --- tile selection (byte-budgeted, VMEM-safe on v5e/v6e/v7x) --------------------
    budget = vmem_budget_per_buffer
    row_bytes = W * dtype_bytes

    if Mg < 16 or row_bytes * 8 > budget:
        if row_bytes * 8 > budget:
            # Even 8 rows exceed the budget: tile the lane axis too (block width is a
            # multiple of 128, which is always a legal block shape).
            tb = Mg if Mg < 8 else 8
            tn = max(128, (budget // max(tb * dtype_bytes, 1)) // 128 * 128)
            tn = min(tn, W)
        else:
            # Small row count: single full block (full dims are always legal).
            tb = Mg
            tn = W
    else:
        tn = W
        tb = (budget // row_bytes) // 8 * 8
        # Guarantee >= 2 grid steps so the parallel axis can shard across both v7x TCs.
        tb = max(8, min(tb, _round_up(pl.cdiv(Mg, 2), 8), Mg))

    grid = (pl.cdiv(Mg, tb), pl.cdiv(W, tn))

    out_flat = pl.pallas_call(
        pos_enc_kernel,
        out_shape=jax.ShapeDtypeStruct((Mg, W), x.dtype),
        grid_spec=pltpu.PrefetchScalarGridSpec(
            num_scalar_prefetch=0,
            grid=grid,
            in_specs=[
                pl.BlockSpec((tb, tn), lambda i, j: (i, j)),   # x tile, pipelined
                pl.BlockSpec((1, tn), lambda i, j: (0, j)),    # pe, resident across rows
            ],
            out_specs=pl.BlockSpec((tb, tn), lambda i, j: (i, j)),
        ),
        compiler_params=pltpu.CompilerParams(
            dimension_semantics=("parallel", "parallel"),      # megacore sharding on v7x
            # 2x double-buffered ~4 MiB x/out tiles + tiny pe slab << 32 MiB,
            # safe on v5e/v6e (128 MiB) and v7x (64 MiB physical).
            vmem_limit_bytes=32 * 1024 * 1024,
        ),
    )(x_flat, pe_flat)

    return out_flat.reshape(B, C, T, D)


def _reference(x, pos_enc):
    """Plain-JAX reference of the torch forward."""
    return x + pos_enc[: x.shape[2]].astype(x.dtype)


if __name__ == "__main__":
    key = jax.random.PRNGKey(0)

    # 1) Small shape consistent with the module: batch=2, channels=4, seq=8, hidden=32.
    #    Fallback disabled so the Pallas kernel path is actually exercised.
    B, C, T, D = 2, 4, 8, 32
    pos_enc = build_pos_enc(64, D)
    x = jax.random.normal(key, (B, C, T, D), jnp.float32)
    out = positional_encoding_forward(x, pos_enc, small_fallback_bytes=0)
    out = jax.block_until_ready(out)
    ref = _reference(x, pos_enc)
    assert out.shape == ref.shape
    assert jnp.allclose(out, ref, atol=1e-6), "positional encoding output mismatch (small)"

    # 2) Larger row count (M=512): exercises byte-budgeted tiling + >=2 grid steps.
    B2, C2, T2, D2 = 8, 64, 8, 32
    pos_enc2 = build_pos_enc(64, D2)
    x2 = jax.random.normal(jax.random.PRNGKey(0), (B2, C2, T2, D2), jnp.float32)
    out2 = jax.block_until_ready(
        positional_encoding_forward(x2, pos_enc2, small_fallback_bytes=0))
    assert jnp.allclose(out2, _reference(x2, pos_enc2), atol=1e-6), "mismatch (large M)"

    # 3) T*D not a multiple of 128 (T*D=192): exercises the row-grouping (g=2) path.
    B3, C3, T3, D3 = 2, 8, 8, 24
    pos_enc3 = build_pos_enc(64, D3)
    x3 = jax.random.normal(jax.random.PRNGKey(0), (B3, C3, T3, D3), jnp.float32)
    out3 = jax.block_until_ready(
        positional_encoding_forward(x3, pos_enc3, small_fallback_bytes=0))
    assert jnp.allclose(out3, _reference(x3, pos_enc3), atol=1e-6), "mismatch (grouped rows)"

    print("KERNEL_OK")
</pallas_src>

<mosaic_0001>
module attributes {stable_mosaic.version = 11 : i64} {
  func.func @pos_enc_kernel(%arg0: i32, %arg1: i32, %arg2: memref<8x256xf32, #tpu.memory_space<vmem>>, %arg3: memref<1x256xf32, #tpu.memory_space<vmem>>, %arg4: memref<8x256xf32, #tpu.memory_space<vmem>>) attributes {dimension_semantics = [#tpu.dimension_semantics<parallel>, #tpu.dimension_semantics<parallel>], iteration_bounds = array<i64: 1, 1>, scalar_prefetch = 0 : i64, scratch_operands = 0 : i64, tpu.core_type = #tpu.core_type<tc>, window_params = [{transform_indices = @transform_0, window_bounds = array<i64: 8, 256>}, {transform_indices = @transform_1, window_bounds = array<i64: 1, 256>}, {transform_indices = @transform_2, window_bounds = array<i64: 8, 256>}]} {
    %c0 = arith.constant 0 : index
    %c0_0 = arith.constant 0 : index
    %0 = vector.load %arg2[%c0, %c0_0] : memref<8x256xf32, #tpu.memory_space<vmem>>, vector<8x256xf32>
    %c0_1 = arith.constant 0 : index
    %c0_2 = arith.constant 0 : index
    %1 = vector.load %arg3[%c0_1, %c0_2] : memref<1x256xf32, #tpu.memory_space<vmem>>, vector<1x256xf32>
    %2 = vector.broadcast %1 : vector<1x256xf32> to vector<8x256xf32>
    %3 = arith.addf %0, %2 : vector<8x256xf32>
    %c0_3 = arith.constant 0 : index
    %c0_4 = arith.constant 0 : index
    %4 = vector.load %arg4[%c0_3, %c0_4] : memref<8x256xf32, #tpu.memory_space<vmem>>, vector<8x256xf32>
    tpu.vector_store %arg4[%c0_3, %c0_4], %3 {strides = array<i32>} : memref<8x256xf32, #tpu.memory_space<vmem>>, vector<8x256xf32>,
    return
  }
  func.func @transform_0(%arg0: i32, %arg1: i32) -> (i32, i32) {
    %c0_i32 = arith.constant 0 : i32
    return %arg0, %arg1 : i32, i32
  }
  func.func @transform_1(%arg0: i32, %arg1: i32) -> (i32, i32) {
    %c0_i32 = arith.constant 0 : i32
    %c0_i32_0 = arith.constant 0 : i32
    return %c0_i32, %arg1 : i32, i32
  }
  func.func @transform_2(%arg0: i32, %arg1: i32) -> (i32, i32) {
    %c0_i32 = arith.constant 0 : i32
    return %arg0, %arg1 : i32, i32
  }
}

</mosaic_0001>

<bundles_post_ra>
// kernel: tpu_custom_call.1
= control target key start
LH: loop header
LB: loop body
LE: loop exit
PB: predicated region body
PF: predicated region fallthrough
CT: control target
= control target key end

     0   :  { %7 = vsyncpa [#allocation3], 0  ;;  %s151_s0 = inlined_call_operand.hbm [shape: f32[8,256], index: 0, kind: input, shape index: {}]   ;;  %s152_s1 = inlined_call_operand.vmem [shape: f32[1,256], index: 1, kind: input, shape index: {}]   ;;  %s153_s2 = inlined_call_operand.hbm [shape: f32[8,256], index: 2, kind: output, shape index: {}]  }
   0x1   :  { %8 = vsyncpa [#allocation4], 0  ;;  %s107_s9 = smov [#allocation2]   ;;  %s59_s13 = scalar_lea.hbm %s151_s0, 256 }
   0x2   :  { %s15_s10 = sshll.u32 %s107_s9, 4  ;;  %p60_p0 = scmp.ne.s32.totalorder %s151_s0, %s59_s13  ;;  %s16_s10 = int_to_ptr.vmem [resolvable:$true] %s15_s10 }
   0x3   :  { %p63_p1 = scmp.lt.u32.totalorder %s59_s13, %s151_s0 }
   0x5   :  { %p65_p2 = pnand %p63_p1, %p60_p0 }
   0x7   :  { %68 = shalt.err (!%p65_p2)
}
   0x8   :  { %s69_s18 = scalar_lea.vmem %s16_s10, 256  ;;  %p74_p4 = scmp.lt.s32.totalorder %s16_s10, %s16_s10 }
   0x9   :  { %p70_p3 = scmp.ne.s32.totalorder %s16_s10, %s69_s18  ;;  %p75_p5 = scmp.lt.s32.totalorder %s69_s18, %s69_s18 }
   0xb   :  { %p76_p6 = por %p75_p5, %p74_p4 }
   0xd   :  { %p77_p7 = pnand %p76_p6, %p70_p3 }
   0xf   :  { %80 = shalt.err (!%p77_p7)
}
  0x10   :  { %18 = dma.hbm_to_vmem [thread:$0]  %s151_s0, 256, %s16_s10, [#allocation3]  }
  0x11   :  { %103 = dma.done.wait [#allocation3], 256  }
  0x12   :  { %104 = vsyncadd [#allocation3], 4294967040  ;;  %v28_v0 = vlaneseq  ;;  %v24_v4 = vld [vmem:[#allocation2] sm:$0xff]  ;;  %v25_v6 = vld [vmem:[#allocation2 + $0x8] sm:$0xff]  ;;  %s108_s23 = smov [#allocation5]  }
  0x13   :  { %v26_v5 = vld [vmem:[%s152_s1] sm:$0x3]  ;;  %s48_s24 = sshll.u32 %s108_s23, 4  ;;  %s49_s24 = int_to_ptr.vmem [resolvable:$true] %s48_s24 }
  0x14   :  { %v29_v1 = vshrl.u32 %v28_v0, 7  ;;  %s81_s0 = scalar_lea.vmem %s49_s24, 256  ;;  %p86_p9 = scmp.lt.s32.totalorder %s49_s24, %s49_s24 }
  0x15   :  { %p82_p8 = scmp.ne.s32.totalorder %s49_s24, %s81_s0  ;;  %p87_p10 = scmp.lt.s32.totalorder %s81_s0, %s81_s0 }
  0x16   :  { %v30_v2 = vsub.s32 0, %v29_v1  ;;  %v34_v3 = vsub.s32 1, %v29_v1 }
  0x17   :  { %p88_p11 = por %p87_p10, %p86_p9 }
  0x18   :  { %v31_v7 = vrot.slane %v26_v5, %v30_v2  ;;  %v35_v8 = vrot.slane %v26_v5, %v34_v3 }
  0x19   :  { %p89_p12 = pnand %p88_p11, %p82_p8 }
  0x1a   :  { %v38_v9 = vadd.f32 %v31_v7, %v24_v4  ;;  %v39_v10 = vadd.f32 %v35_v8, %v25_v6 }
  0x1c   :  { %40 = vst [vmem:[#allocation5] sm:$0xff] %v38_v9  ;;  %41 = vst [vmem:[#allocation5 + $0x8] sm:$0xff] %v39_v10 }
  0x1d   :  { %92 = shalt.err (!%p89_p12)
}
  0x1e   :  { %s93_s1 = scalar_lea.hbm %s153_s2, 256 }
  0x1f   :  { %p94_p13 = scmp.ne.s32.totalorder %s153_s2, %s93_s1  ;;  %p97_p0 = scmp.lt.u32.totalorder %s93_s1, %s153_s2 }
  0x21   :  { %p99_p1 = pnand %p97_p0, %p94_p13 }
  0x23   :  { %102 = shalt.err (!%p99_p1)
}
  0x24   :  { %51 = dma.vmem_to_hbm [thread:$0]  %s49_s24, 256, %s153_s2, [#allocation4]  }
  0x25   :  { %105 = dma.done.wait [#allocation4], 256  }
  0x26   :  { %106 = vsyncadd [#allocation4], 4294967040 }
  0x27   :  { %55 = vsyncpa [#allocation3], 1 }
  0x28   :  { %56 = vsyncpa [#allocation4], 1 }

</bundles_post_ra>
